<compile_context>
chip_gen: v7x
topology: tpu7x:2x2x1
jax: 0.10.0
libtpu: 0.0.40
codegen_flags: <defaults>
</compile_context>

<pallas_src>
import functools

import jax
import jax.numpy as jnp
import numpy as np
from jax.experimental import pallas as pl
from jax.experimental.pallas import tpu as pltpu

_LANES = 128


def _cdiv(a, b):
    return -(-a // b)


def _tversky_stats_kernel(pred_ref, tgt_ref, out_ref, acc_i, acc_p, acc_t, *,
                          num_classes, ignore_index, hw):
    """One (batch b, split s, spatial tile k) grid step.

    pred_ref : (1, C, S, 128)    logits (wire dtype; upcast to f32 here)
    tgt_ref  : (1, 1, S, 128)    integer labels (any integer dtype)
    out_ref  : (1, 1, 3, C, 128) per-(sample, split) partial stats, written at the
               last tile of the split:
                 [0] = sum(valid * onehot * softmax)   (intersection)
                 [1] = sum(valid * softmax)
                 [2] = sum(valid * onehot)
               (the lane axis still holds 128 partial sums; wrapper reduces it)
    acc_*    : (C, 128) f32 running per-class partial sums (private per core)
    """
    c = num_classes
    k = pl.program_id(2)

    @pl.when(k == 0)
    def _init():
        acc_i[...] = jnp.zeros_like(acc_i)
        acc_p[...] = jnp.zeros_like(acc_p)
        acc_t[...] = jnp.zeros_like(acc_t)

    p = pred_ref[0].astype(jnp.float32)            # (C, S, L)
    t = tgt_ref[0, 0].astype(jnp.int32)            # (S, L)
    s = p.shape[1]

    # Validity from the label AND from the flat pixel index.  The index mask covers
    # lane padding, the ragged (partial) last tile and any out-of-range block, so no
    # HBM-side padding of the logits is required.
    blk = pl.program_id(1) * pl.num_programs(2) + k          # logical tile index
    row_i = jax.lax.broadcasted_iota(jnp.int32, (s, _LANES), 0)
    lane_i = jax.lax.broadcasted_iota(jnp.int32, (s, _LANES), 1)
    flat = (blk * s + row_i) * _LANES + lane_i
    valid = jnp.logical_and(t != ignore_index, flat < hw)     # (S, L) bool

    # Softmax over the leading channel axis: elementwise VPU max/sum over C slabs
    # (no cross-sublane reduce), one exact reciprocal per pixel.
    m = jnp.max(p, axis=0, keepdims=True)                     # (1, S, L)
    e = jnp.exp(p - m)
    z = jnp.sum(e, axis=0, keepdims=True)
    sm = e * pl.reciprocal(z, approx=False)                   # (C, S, L)

    # Fold the valid mask into the label (sentinel class == C): one compare gives
    # onehot*valid.  Keep summands select-masked so garbage in an out-of-bounds tail
    # can never reach the accumulators (x*0 would keep NaN/Inf, a select does not).
    tgt_m = jnp.where(valid, jnp.clip(t, 0, c - 1), c)        # (S, L)
    cls_iota = jax.lax.broadcasted_iota(jnp.int32, p.shape, 0)
    ohv = cls_iota == tgt_m[None]                             # (C, S, L) bool

    acc_i[...] += jnp.sum(jnp.where(ohv, sm, 0.0), axis=1)
    acc_p[...] += jnp.sum(jnp.where(valid[None], sm, 0.0), axis=1)
    acc_t[...] += jnp.sum(ohv.astype(jnp.float32), axis=1)

    @pl.when(k == pl.num_programs(2) - 1)
    def _finalize():
        out_ref[0, 0, 0] = acc_i[...]
        out_ref[0, 0, 1] = acc_p[...]
        out_ref[0, 0, 2] = acc_t[...]


def tversky_loss_pallas(pred_nchw, target_nhw, *, alpha=0.3, beta=0.7, eps=1e-6,
                        loss_weight=1.0, ignore_index=255, class_weight=None,
                        reduction='mean', avg_factor=None,
                        max_block_elems=1024 * 1024):
    """TverskyLoss.forward: pred (N,C,H,W) logits, target (N,H,W) labels -> (N,) loss."""
    n, c, h, w = pred_nchw.shape
    assert target_nhw.shape == (n, h, w)
    hw = h * w

    # Static class-id selection identical to tversky_loss().
    if c == 1:
        class_ids = [0] if ignore_index != 0 else []
    elif c == 2:
        class_ids = [1] if ignore_index != 1 else []
    else:
        class_ids = [i for i in range(c) if i != ignore_index]
    assert len(class_ids) >= 1

    # ---- spatial layout: HW -> (rows, 128) lanes -------------------------------
    rows = _cdiv(hw, _LANES)
    lane_pad = rows * _LANES - hw

    # Spatial tile rows from an element budget (f32 temporaries dominate VMEM, so
    # budget elements not wire bytes).  Multiple of 32 rows keeps (8|16|32, 128)
    # tiling legal for f32/bf16 logits and int32/int16/uint8 labels.
    s_tile = max(32, (max_block_elems // (c * _LANES)) // 32 * 32)
    if rows <= s_tile:
        s_tile = rows           # single full-extent block (any row count is legal)
    blocks_total = _cdiv(rows, s_tile)

    # 2-way spatial split on a parallel axis, only when it divides evenly (so the
    # split never creates extra DMA on single-core chips) -> both v7x cores busy
    # even for batch size 1.
    n_splits = 2 if (blocks_total >= 2 and blocks_total % 2 == 0) else 1
    num_s = blocks_total // n_splits

    pred = pred_nchw.reshape(n, c, hw)                  # keep wire dtype (bf16 ok)
    tgt = target_nhw.reshape(n, hw)                     # keep narrow int dtype
    if not jnp.issubdtype(tgt.dtype, jnp.integer):
        tgt = tgt.astype(jnp.int32)
    if lane_pad:
        # TODO(synk): only hit when H*W % 128 != 0; the (rows,128) relayout then
        # needs a <128-element tail pad (one extra HBM copy of pred).
        pred = jnp.pad(pred, ((0, 0), (0, 0), (0, lane_pad)))
        tgt = jnp.pad(tgt, ((0, 0), (0, lane_pad)))     # pad value irrelevant (index mask)
    pred = pred.reshape(n, c, rows, _LANES)
    tgt = tgt.reshape(n, 1, rows, _LANES)

    kernel = functools.partial(_tversky_stats_kernel, num_classes=c,
                               ignore_index=int(ignore_index), hw=hw)

    stats = pl.pallas_call(
        kernel,
        out_shape=jax.ShapeDtypeStruct((n, n_splits, 3, c, _LANES), jnp.float32),
        grid_spec=pltpu.PrefetchScalarGridSpec(
            num_scalar_prefetch=0,
            grid=(n, n_splits, num_s),
            in_specs=[
                pl.BlockSpec((1, c, s_tile, _LANES),
                             lambda b, s, k: (b, 0, s * num_s + k, 0)),
                pl.BlockSpec((1, 1, s_tile, _LANES),
                             lambda b, s, k: (b, 0, s * num_s + k, 0)),
            ],
            out_specs=pl.BlockSpec((1, 1, 3, c, _LANES),
                                   lambda b, s, k: (b, s, 0, 0, 0)),
            scratch_shapes=[pltpu.VMEM((c, _LANES), jnp.float32),
                            pltpu.VMEM((c, _LANES), jnp.float32),
                            pltpu.VMEM((c, _LANES), jnp.float32)],
        ),
        compiler_params=pltpu.CompilerParams(
            dimension_semantics=("parallel", "parallel", "arbitrary"),
            vmem_limit_bytes=48 * 1024 * 1024),
    )(pred, tgt)

    # ---- tiny wrapper epilogue: Tversky ratio + class / reduction weighting ----
    per_class = stats.sum(axis=(1, 4))                              # (N, 3, C)
    inter, sum_p, sum_t = per_class[:, 0], per_class[:, 1], per_class[:, 2]
    fps = sum_p - inter                                             # sum(vp * (1 - vt))
    fns = sum_t - inter                                             # sum((1 - vp) * vt)
    cls_loss = 1.0 - inter / (inter + alpha * fps + beta * fns + eps)   # (N, C)

    if reduction == 'none':
        assert avg_factor is None
        out = []
        for i in class_ids:
            li = cls_loss[:, i]
            if class_weight is not None:
                li = li * float(class_weight[i])
            out.append(loss_weight * li)
        return out

    wvec = np.zeros((c,), np.float32)
    for i in class_ids:
        wvec[i] = float(class_weight[i]) if class_weight is not None else 1.0
    if reduction == 'mean':
        wvec /= float(avg_factor) if avg_factor is not None else float(len(class_ids))
    elif reduction == 'sum':
        assert avg_factor is None, 'avg_factor can not be used with reduction="sum"'
    else:
        raise ValueError(f'unknown reduction type: {reduction}')
    wvec *= float(loss_weight)
    return cls_loss @ jnp.asarray(wvec)                             # (N,)


def tversky_loss_ref(pred, target, *, alpha=0.3, beta=0.7, eps=1e-6,
                     loss_weight=1.0, ignore_index=255, class_weight=None,
                     reduction='mean', avg_factor=None):
    """Pure-JAX transcription of the PyTorch reference (validation only)."""
    n, c, h, w = pred.shape
    t32 = target.astype(jnp.int32)
    sm = jax.nn.softmax(pred.astype(jnp.float32), axis=1)
    one_hot = jax.nn.one_hot(jnp.clip(t32, 0, c - 1), c)            # (N,H,W,C)
    valid = (t32 != ignore_index).astype(jnp.float32)               # (N,H,W)
    if c == 1:
        class_ids = [0] if ignore_index != 0 else []
    elif c == 2:
        class_ids = [1] if ignore_index != 1 else []
    else:
        class_ids = [i for i in range(c) if i != ignore_index]
    vm = valid.reshape(n, -1)
    class_losses = []
    for i in class_ids:
        p = sm[:, i].reshape(n, -1)
        tg = one_hot[..., i].reshape(n, -1)
        vp = p * vm
        vt = tg * vm
        inter = jnp.sum(vp * vt, axis=1)
        fps = jnp.sum(vp * (1.0 - vt), axis=1)
        fns = jnp.sum((1.0 - vp) * vt, axis=1)
        li = 1.0 - inter / (inter + alpha * fps + beta * fns + eps)
        if class_weight is not None:
            li = li * float(class_weight[i])
        class_losses.append(li)
    if avg_factor is None:
        loss = sum(class_losses)
        if reduction == 'mean':
            loss = loss / float(len(class_ids))
    else:
        loss = sum(class_losses) / avg_factor
    return loss_weight * loss


if __name__ == "__main__":
    key = jax.random.PRNGKey(0)
    ks = jax.random.split(key, 8)

    # Case 1: small NCHW logits, int32 labels, some ignore_index pixels (single block).
    N, C, H, W = 2, 4, 16, 16
    pred = jax.random.normal(ks[0], (N, C, H, W), dtype=jnp.float32)
    target = jax.random.randint(ks[1], (N, H, W), 0, C).astype(jnp.int32)
    target = target.at[0, 0, :4].set(255)
    loss = jax.block_until_ready(tversky_loss_pallas(pred, target))
    ref = tversky_loss_ref(pred, target)
    assert loss.shape == (N,)
    assert jnp.allclose(loss, ref, atol=1e-4, rtol=1e-4), (loss, ref)

    # Case 2: H*W not a multiple of 128 (lane-pad path), uint8 labels on the wire,
    # ignore_index < C (class exclusion).
    N2, C2, H2, W2 = 2, 3, 10, 10
    pred2 = jax.random.normal(ks[2], (N2, C2, H2, W2), dtype=jnp.float32)
    target2 = jax.random.randint(ks[3], (N2, H2, W2), 0, C2).astype(jnp.uint8)
    loss2 = jax.block_until_ready(tversky_loss_pallas(pred2, target2, ignore_index=1))
    ref2 = tversky_loss_ref(pred2, target2, ignore_index=1)
    assert jnp.allclose(loss2, ref2, atol=1e-4, rtol=1e-4), (loss2, ref2)

    # Case 3: multi-tile spatial reduction with a ragged (partial) last tile — no
    # HBM-side padding, handled by the in-kernel index mask.
    N3, C3, H3, W3 = 1, 4, 80, 128
    pred3 = jax.random.normal(ks[4], (N3, C3, H3, W3), dtype=jnp.float32)
    target3 = jax.random.randint(ks[5], (N3, H3, W3), 0, C3).astype(jnp.int32)
    target3 = target3.at[0, :2].set(255)
    loss3 = jax.block_until_ready(
        tversky_loss_pallas(pred3, target3, max_block_elems=C3 * 32 * 128))
    ref3 = tversky_loss_ref(pred3, target3)
    assert jnp.allclose(loss3, ref3, atol=1e-4, rtol=1e-4), (loss3, ref3)

    # Case 4: even block count -> 2-way spatial split (both v7x cores at N=1), plus
    # class_weight / reduction='sum' / loss_weight folded in the epilogue.
    N4, C4, H4, W4 = 1, 4, 128, 128
    cw = [0.5, 1.0, 1.5, 2.0]
    pred4 = jax.random.normal(ks[6], (N4, C4, H4, W4), dtype=jnp.float32)
    target4 = jax.random.randint(ks[7], (N4, H4, W4), 0, C4).astype(jnp.int32)
    target4 = target4.at[0, 5, 5:20].set(255)
    loss4 = jax.block_until_ready(
        tversky_loss_pallas(pred4, target4, class_weight=cw, reduction='sum',
                            loss_weight=2.0, max_block_elems=C4 * 32 * 128))
    ref4 = tversky_loss_ref(pred4, target4, class_weight=cw, reduction='sum',
                            loss_weight=2.0)
    assert jnp.allclose(loss4, ref4, atol=1e-4, rtol=1e-4), (loss4, ref4)

    print("KERNEL_OK")
</pallas_src>

<mosaic_0001>
module attributes {stable_mosaic.version = 11 : i64} {
  func.func @_tversky_stats_kernel(%arg0: i32, %arg1: i32, %arg2: i32, %arg3: memref<1x4x2x128xf32, #tpu.memory_space<vmem>>, %arg4: memref<1x1x2x128xi32, #tpu.memory_space<vmem>>, %arg5: memref<1x1x3x4x128xf32, #tpu.memory_space<vmem>>, %arg6: memref<4x128xf32, #tpu.memory_space<vmem>>, %arg7: memref<4x128xf32, #tpu.memory_space<vmem>>, %arg8: memref<4x128xf32, #tpu.memory_space<vmem>>) attributes {dimension_semantics = [#tpu.dimension_semantics<parallel>, #tpu.dimension_semantics<parallel>, #tpu.dimension_semantics<arbitrary>], iteration_bounds = array<i64: 2, 1, 1>, scalar_prefetch = 0 : i64, scratch_operands = 3 : i64, tpu.core_type = #tpu.core_type<tc>, window_params = [{transform_indices = @transform_0, window_bounds = array<i64: 1, 4, 2, 128>}, {transform_indices = @transform_1, window_bounds = array<i64: 1, 1, 2, 128>}, {transform_indices = @transform_2, window_bounds = array<i64: 1, 1, 3, 4, 128>}]} {
    %c0_i32 = arith.constant 0 : i32
    %0 = arith.cmpi eq, %arg2, %c0_i32 : i32
    %1 = arith.extui %0 : i1 to i32
    %c0_i32_0 = arith.constant 0 : i32
    %2 = arith.cmpi ne, %1, %c0_i32_0 : i32
    scf.if %2 {
      %cst_29 = arith.constant 0.000000e+00 : f32
      %66 = vector.broadcast %cst_29 : f32 to vector<4x128xf32>
      %c0_30 = arith.constant 0 : index
      %c0_31 = arith.constant 0 : index
      %67 = vector.load %arg6[%c0_30, %c0_31] : memref<4x128xf32, #tpu.memory_space<vmem>>, vector<4x128xf32>
      tpu.vector_store %arg6[%c0_30, %c0_31], %66 {strides = array<i32>} : memref<4x128xf32, #tpu.memory_space<vmem>>, vector<4x128xf32>,
      %cst_32 = arith.constant 0.000000e+00 : f32
      %68 = vector.broadcast %cst_32 : f32 to vector<4x128xf32>
      %c0_33 = arith.constant 0 : index
      %c0_34 = arith.constant 0 : index
      %69 = vector.load %arg7[%c0_33, %c0_34] : memref<4x128xf32, #tpu.memory_space<vmem>>, vector<4x128xf32>
      tpu.vector_store %arg7[%c0_33, %c0_34], %68 {strides = array<i32>} : memref<4x128xf32, #tpu.memory_space<vmem>>, vector<4x128xf32>,
      %cst_35 = arith.constant 0.000000e+00 : f32
      %70 = vector.broadcast %cst_35 : f32 to vector<4x128xf32>
      %c0_36 = arith.constant 0 : index
      %c0_37 = arith.constant 0 : index
      %71 = vector.load %arg8[%c0_36, %c0_37] : memref<4x128xf32, #tpu.memory_space<vmem>>, vector<4x128xf32>
      tpu.vector_store %arg8[%c0_36, %c0_37], %70 {strides = array<i32>} : memref<4x128xf32, #tpu.memory_space<vmem>>, vector<4x128xf32>,
    } else {
    }
    %c0 = arith.constant 0 : index
    %c0_1 = arith.constant 0 : index
    %c0_2 = arith.constant 0 : index
    %c0_3 = arith.constant 0 : index
    %3 = vector.load %arg3[%c0, %c0_1, %c0_2, %c0_3] : memref<1x4x2x128xf32, #tpu.memory_space<vmem>>, vector<1x4x2x128xf32>
    %4 = vector.shape_cast %3 : vector<1x4x2x128xf32> to vector<4x2x128xf32>
    %c0_4 = arith.constant 0 : index
    %c0_5 = arith.constant 0 : index
    %c0_6 = arith.constant 0 : index
    %c0_7 = arith.constant 0 : index
    %5 = vector.load %arg4[%c0_4, %c0_5, %c0_6, %c0_7] : memref<1x1x2x128xi32, #tpu.memory_space<vmem>>, vector<1x1x2x128xi32>
    %6 = vector.shape_cast %5 : vector<1x1x2x128xi32> to vector<2x128xi32>
    %c1_i32 = arith.constant 1 : i32
    %7 = arith.muli %arg1, %c1_i32 : i32
    %8 = arith.addi %7, %arg2 : i32
    %9 = tpu.iota {dimensions = array<i32: 0>} : vector<2x128xi32>
    %10 = tpu.iota {dimensions = array<i32: 1>} : vector<2x128xi32>
    %c2_i32 = arith.constant 2 : i32
    %11 = arith.muli %8, %c2_i32 : i32
    %12 = vector.broadcast %11 : i32 to vector<2x128xi32>
    %13 = arith.addi %12, %9 : vector<2x128xi32>
    %c128_i32 = arith.constant 128 : i32
    %14 = vector.broadcast %c128_i32 : i32 to vector<2x128xi32>
    %15 = arith.muli %13, %14 : vector<2x128xi32>
    %16 = arith.addi %15, %10 : vector<2x128xi32>
    %c255_i32 = arith.constant 255 : i32
    %17 = vector.broadcast %c255_i32 : i32 to vector<2x128xi32>
    %18 = arith.cmpi ne, %6, %17 : vector<2x128xi32>
    %c256_i32 = arith.constant 256 : i32
    %19 = vector.broadcast %c256_i32 : i32 to vector<2x128xi32>
    %20 = arith.cmpi slt, %16, %19 : vector<2x128xi32>
    %21 = arith.andi %18, %20 : vector<2x128xi1>
    %cst = arith.constant dense<0xFF800000> : vector<2x128xf32>
    %22 = vector.multi_reduction <maximumf>, %4, %cst [0] : vector<4x2x128xf32> to vector<2x128xf32>
    %23 = vector.shape_cast %22 : vector<2x128xf32> to vector<1x2x128xf32>
    %24 = vector.broadcast %23 : vector<1x2x128xf32> to vector<4x2x128xf32>
    %25 = arith.subf %4, %24 : vector<4x2x128xf32>
    %26 = math.exp %25 : vector<4x2x128xf32>
    %cst_8 = arith.constant dense<0.000000e+00> : vector<2x128xf32>
    %27 = vector.multi_reduction <add>, %26, %cst_8 [0] : vector<4x2x128xf32> to vector<2x128xf32>
    %28 = vector.shape_cast %27 : vector<2x128xf32> to vector<1x2x128xf32>
    %29 = tpu.reciprocal %28 : vector<1x2x128xf32> -> vector<1x2x128xf32>
    %30 = vector.broadcast %29 : vector<1x2x128xf32> to vector<4x2x128xf32>
    %31 = arith.mulf %26, %30 : vector<4x2x128xf32>
    %c0_i32_9 = arith.constant 0 : i32
    %c3_i32 = arith.constant 3 : i32
    %32 = vector.broadcast %c0_i32_9 : i32 to vector<2x128xi32>
    %33 = arith.maxsi %32, %6 : vector<2x128xi32>
    %34 = vector.broadcast %c3_i32 : i32 to vector<2x128xi32>
    %35 = arith.minsi %34, %33 : vector<2x128xi32>
    %c4_i32 = arith.constant 4 : i32
    %36 = vector.broadcast %c4_i32 : i32 to vector<2x128xi32>
    %37 = arith.select %21, %35, %36 : vector<2x128xi1>, vector<2x128xi32>
    %38 = tpu.iota {dimensions = array<i32: 0>} : vector<4x2x128xi32>
    %39 = vector.shape_cast %37 : vector<2x128xi32> to vector<1x2x128xi32>
    %40 = vector.broadcast %39 : vector<1x2x128xi32> to vector<4x2x128xi32>
    %41 = arith.cmpi eq, %38, %40 : vector<4x2x128xi32>
    %c0_10 = arith.constant 0 : index
    %c0_11 = arith.constant 0 : index
    %42 = vector.load %arg6[%c0_10, %c0_11] : memref<4x128xf32, #tpu.memory_space<vmem>>, vector<4x128xf32>
    %cst_12 = arith.constant 0.000000e+00 : f32
    %43 = vector.broadcast %cst_12 : f32 to vector<4x2x128xf32>
    %44 = arith.select %41, %31, %43 : vector<4x2x128xi1>, vector<4x2x128xf32>
    %cst_13 = arith.constant dense<0.000000e+00> : vector<4x128xf32>
    %45 = vector.multi_reduction <add>, %44, %cst_13 [1] : vector<4x2x128xf32> to vector<4x128xf32>
    %46 = arith.addf %42, %45 : vector<4x128xf32>
    %c0_14 = arith.constant 0 : index
    %c0_15 = arith.constant 0 : index
    %47 = vector.load %arg6[%c0_14, %c0_15] : memref<4x128xf32, #tpu.memory_space<vmem>>, vector<4x128xf32>
    tpu.vector_store %arg6[%c0_14, %c0_15], %46 {strides = array<i32>} : memref<4x128xf32, #tpu.memory_space<vmem>>, vector<4x128xf32>,
    %c0_16 = arith.constant 0 : index
    %c0_17 = arith.constant 0 : index
    %48 = vector.load %arg7[%c0_16, %c0_17] : memref<4x128xf32, #tpu.memory_space<vmem>>, vector<4x128xf32>
    %49 = vector.shape_cast %21 : vector<2x128xi1> to vector<1x2x128xi1>
    %cst_18 = arith.constant 0.000000e+00 : f32
    %50 = vector.shape_cast %49 : vector<1x2x128xi1> to vector<1x2x128xi1>
    %51 = vector.broadcast %50 : vector<1x2x128xi1> to vector<4x2x128xi1>
    %52 = vector.broadcast %cst_18 : f32 to vector<4x2x128xf32>
    %53 = arith.select %51, %31, %52 : vector<4x2x128xi1>, vector<4x2x128xf32>
    %cst_19 = arith.constant dense<0.000000e+00> : vector<4x128xf32>
    %54 = vector.multi_reduction <add>, %53, %cst_19 [1] : vector<4x2x128xf32> to vector<4x128xf32>
    %55 = arith.addf %48, %54 : vector<4x128xf32>
    %c0_20 = arith.constant 0 : index
    %c0_21 = arith.constant 0 : index
    %56 = vector.load %arg7[%c0_20, %c0_21] : memref<4x128xf32, #tpu.memory_space<vmem>>, vector<4x128xf32>
    tpu.vector_store %arg7[%c0_20, %c0_21], %55 {strides = array<i32>} : memref<4x128xf32, #tpu.memory_space<vmem>>, vector<4x128xf32>,
    %c0_22 = arith.constant 0 : index
    %c0_23 = arith.constant 0 : index
    %57 = vector.load %arg8[%c0_22, %c0_23] : memref<4x128xf32, #tpu.memory_space<vmem>>, vector<4x128xf32>
    %58 = arith.extui %41 : vector<4x2x128xi1> to vector<4x2x128xi32>
    %59 = arith.sitofp %58 : vector<4x2x128xi32> to vector<4x2x128xf32>
    %cst_24 = arith.constant dense<0.000000e+00> : vector<4x128xf32>
    %60 = vector.multi_reduction <add>, %59, %cst_24 [1] : vector<4x2x128xf32> to vector<4x128xf32>
    %61 = arith.addf %57, %60 : vector<4x128xf32>
    %c0_25 = arith.constant 0 : index
    %c0_26 = arith.constant 0 : index
    %62 = vector.load %arg8[%c0_25, %c0_26] : memref<4x128xf32, #tpu.memory_space<vmem>>, vector<4x128xf32>
    tpu.vector_store %arg8[%c0_25, %c0_26], %61 {strides = array<i32>} : memref<4x128xf32, #tpu.memory_space<vmem>>, vector<4x128xf32>,
    %c0_i32_27 = arith.constant 0 : i32
    %63 = arith.cmpi eq, %arg2, %c0_i32_27 : i32
    %64 = arith.extui %63 : i1 to i32
    %c0_i32_28 = arith.constant 0 : i32
    %65 = arith.cmpi ne, %64, %c0_i32_28 : i32
    scf.if %65 {
      %c0_29 = arith.constant 0 : index
      %c0_30 = arith.constant 0 : index
      %66 = vector.load %arg6[%c0_29, %c0_30] : memref<4x128xf32, #tpu.memory_space<vmem>>, vector<4x128xf32>
      %c0_31 = arith.constant 0 : index
      %c0_32 = arith.constant 0 : index
      %c0_33 = arith.constant 0 : index
      %c0_34 = arith.constant 0 : index
      %c0_35 = arith.constant 0 : index
      %67 = vector.load %arg5[%c0_31, %c0_32, %c0_33, %c0_34, %c0_35] : memref<1x1x3x4x128xf32, #tpu.memory_space<vmem>>, vector<1x1x1x4x128xf32>
      %68 = vector.shape_cast %67 : vector<1x1x1x4x128xf32> to vector<4x128xf32>
      %69 = vector.shape_cast %66 : vector<4x128xf32> to vector<1x1x1x4x128xf32>
      tpu.vector_store %arg5[%c0_31, %c0_32, %c0_33, %c0_34, %c0_35], %69 {strides = array<i32>} : memref<1x1x3x4x128xf32, #tpu.memory_space<vmem>>, vector<1x1x1x4x128xf32>,
      %c0_36 = arith.constant 0 : index
      %c0_37 = arith.constant 0 : index
      %70 = vector.load %arg7[%c0_36, %c0_37] : memref<4x128xf32, #tpu.memory_space<vmem>>, vector<4x128xf32>
      %c0_38 = arith.constant 0 : index
      %c0_39 = arith.constant 0 : index
      %c1 = arith.constant 1 : index
      %c0_40 = arith.constant 0 : index
      %c0_41 = arith.constant 0 : index
      %71 = vector.load %arg5[%c0_38, %c0_39, %c1, %c0_40, %c0_41] : memref<1x1x3x4x128xf32, #tpu.memory_space<vmem>>, vector<1x1x1x4x128xf32>
      %72 = vector.shape_cast %71 : vector<1x1x1x4x128xf32> to vector<4x128xf32>
      %73 = vector.shape_cast %70 : vector<4x128xf32> to vector<1x1x1x4x128xf32>
      tpu.vector_store %arg5[%c0_38, %c0_39, %c1, %c0_40, %c0_41], %73 {strides = array<i32>} : memref<1x1x3x4x128xf32, #tpu.memory_space<vmem>>, vector<1x1x1x4x128xf32>,
      %c0_42 = arith.constant 0 : index
      %c0_43 = arith.constant 0 : index
      %74 = vector.load %arg8[%c0_42, %c0_43] : memref<4x128xf32, #tpu.memory_space<vmem>>, vector<4x128xf32>
      %c0_44 = arith.constant 0 : index
      %c0_45 = arith.constant 0 : index
      %c2 = arith.constant 2 : index
      %c0_46 = arith.constant 0 : index
      %c0_47 = arith.constant 0 : index
      %75 = vector.load %arg5[%c0_44, %c0_45, %c2, %c0_46, %c0_47] : memref<1x1x3x4x128xf32, #tpu.memory_space<vmem>>, vector<1x1x1x4x128xf32>
      %76 = vector.shape_cast %75 : vector<1x1x1x4x128xf32> to vector<4x128xf32>
      %77 = vector.shape_cast %74 : vector<4x128xf32> to vector<1x1x1x4x128xf32>
      tpu.vector_store %arg5[%c0_44, %c0_45, %c2, %c0_46, %c0_47], %77 {strides = array<i32>} : memref<1x1x3x4x128xf32, #tpu.memory_space<vmem>>, vector<1x1x1x4x128xf32>,
    } else {
    }
    return
  }
  func.func @transform_0(%arg0: i32, %arg1: i32, %arg2: i32) -> (i32, i32, i32, i32) {
    %c1_i32 = arith.constant 1 : i32
    %0 = arith.muli %arg1, %c1_i32 : i32
    %1 = arith.addi %0, %arg2 : i32
    %c0_i32 = arith.constant 0 : i32
    %c0_i32_0 = arith.constant 0 : i32
    %c0_i32_1 = arith.constant 0 : i32
    return %arg0, %c0_i32, %1, %c0_i32_0 : i32, i32, i32, i32
  }
  func.func @transform_1(%arg0: i32, %arg1: i32, %arg2: i32) -> (i32, i32, i32, i32) {
    %c1_i32 = arith.constant 1 : i32
    %0 = arith.muli %arg1, %c1_i32 : i32
    %1 = arith.addi %0, %arg2 : i32
    %c0_i32 = arith.constant 0 : i32
    %c0_i32_0 = arith.constant 0 : i32
    %c0_i32_1 = arith.constant 0 : i32
    return %arg0, %c0_i32, %1, %c0_i32_0 : i32, i32, i32, i32
  }
  func.func @transform_2(%arg0: i32, %arg1: i32, %arg2: i32) -> (i32, i32, i32, i32, i32) {
    %c0_i32 = arith.constant 0 : i32
    %c0_i32_0 = arith.constant 0 : i32
    %c0_i32_1 = arith.constant 0 : i32
    %c0_i32_2 = arith.constant 0 : i32
    return %arg0, %arg1, %c0_i32, %c0_i32_0, %c0_i32_1 : i32, i32, i32, i32, i32
  }
}

</mosaic_0001>

<bundles_post_ra>
// kernel: tpu_custom_call.1
= control target key start
LH: loop header
LB: loop body
LE: loop exit
PB: predicated region body
PF: predicated region fallthrough
CT: control target
= control target key end

     0   :  { %7 = vsyncpa [#allocation6], 0  ;;  %s1146_s0 = inlined_call_operand.hbm [shape: f32[2,4,2,128], index: 0, kind: input, shape index: {}]   ;;  %s1147_s1 = inlined_call_operand.hbm [shape: s32[2,1,2,128], index: 1, kind: input, shape index: {}]   ;;  %s1148_s2 = inlined_call_operand.hbm [shape: f32[2,1,3,4,128], index: 2, kind: output, shape index: {}]  }
   0x1   :  { %9 = vsyncpa [#allocation6 + $0x1], 0 }
   0x2   :  { %10 = vsyncpa [#allocation9], 0 }
   0x3   :  { %12 = vsyncpa [#allocation9 + $0x1], 0 }
   0x4   :  { %13 = vsyncpa [#allocation7], 0 }
   0x5   :  { %15 = vsyncpa [#allocation7 + $0x1], 0  ;;  %s857_s9 = smov 0   ;;  %s859_s10 = smov 0  }
   0x6   :  { %s861_s11 = smov 0   ;;  %s863_s12 = smov 0  }
   0x7   :  { %s865_s13 = smov 0   ;;  %s867_s14 = smov 0  }
   0x8 LB: > { %s580_s15 = sadd.s32 4294967295, %s832_s14   ;;  %s581_s16 = sadd.s32 4294967294, %s832_s14   ;;  %s832_s14 = sphi %s867_s14, %s21_s14   ;;  %s828_s13 = sphi %s865_s13, %s1169_s13   ;;  %s824_s12 = sphi %s863_s12, %s1168_s12   ;;  %s820_s11 = sphi %s861_s11, %s1167_s11   ;;  %s816_s10 = sphi %s859_s10, %s1166_s10   ;;  %s812_s9 = sphi %s857_s9, %s1165_s9  }
   0x9   : > { %s40_s17 = sadd.s32 1, %s828_s13  ;;  %s51_s18 = sadd.s32 1, %s820_s11 }
   0xa   : > { %p42_p0 = scmp.ge.s32.totalorder %s40_s17, 2  ;;  %p58_p1 = scmp.ne.s32.totalorder %s820_s11, %s816_s10 }
   0xb   : > { %p59_p2 = scmp.eq.s32.totalorder %s832_s14, 0  ;;  %p64_p3 = scmp.ne.s32.totalorder %s816_s10, %s812_s9 }
   0xc   : > { %s1171_s17 = smov (%p42_p0, %s40_s17), 0  ;;  %p65_p5 = scmp.eq.s32.totalorder %s580_s15, 0 }
   0xd   : > { %p898_p4 = por %p59_p2, %p58_p1  ;;  %s46_s20 = ssub.s32 %s828_s13, %s1171_s17 }
   0xe   : > { %p120_p6 = scmp.eq.s32.totalorder %s580_s15, 1  ;;  %p49_p7 = scmp.eq.s32.totalorder %s46_s20, 0 }
   0xf   : > { %p904_p8 = por %p65_p5, %p64_p3  ;;  %p126_p10 = scmp.eq.s32.totalorder %s581_s16, 1 }
  0x10   : > { %p908_p9 = por %p120_p6, %p58_p1  ;;  %p621_p13 = scmp.lt.s32.totalorder %s832_s14, 2 }
  0x11   : > { %s1152_s21 = scalar_select %p904_p8, 1, 0 }
  0x12   : > { %s1153_s22 = scalar_select %p908_p9, 1, 0 }
  0x13   : > { %s913_s23 = scalar_select %p49_p7, %s820_s11, %s51_s18  }
  0x14   : > { %p915_p11 = por %p126_p10, %p64_p3  ;;  %s922_s25 = sand.u32 1, %s820_s11  }
  0x15   : > { %s584_s26 = sshll.u32 %s922_s25, 3  ;;  %s601_s27 = sshll.u32 %s828_s13, 7 }
  0x16   : > { %s1154_s24 = scalar_select %p915_p11, 1, 0 }
  0x17   : > { %s929_s30 = scalar_lea.hbm %s1146_s0, %s601_s27  ;;  %s150_s3 = scalar_lea.vmem [#allocation5], %s584_s26 }
  0x18   : > { %s159_s4 = sshll.u32 %s150_s3, 4  ;;  %p935_p0 = pnand %p621_p13, %p898_p4  ;;  %s931_s4 = int_to_ptr.vmem [resolvable:$true] %s159_s4 }
  0x19   : > { %s147_s6 = scalar_lea.sflag [#allocation6], %s922_s25  ;;  %s686_s7 = scalar_lea.hbm %s929_s30, 128 }
  0x1a   : > { %p687_p2 = scmp.ne.s32.totalorder %s929_s30, %s686_s7  ;;  %p688_p3 = pneg %p935_p0 }
  0x1b   : > { %s691_s16 = scalar_lea.hbm %s1146_s0, 256  ;;  %p692_p4 = scmp.lt.u32.totalorder %s929_s30, %s1146_s0 }
  0x1c   : > { %p689_p5 = pnand %p688_p3, %p687_p2  ;;  %p693_p7 = scmp.lt.u32.totalorder %s691_s16, %s686_s7 }
  0x1d   : > { %p695_p13 = scmp.lt.u32.totalorder %s686_s7, %s929_s30 }
  0x1e   : > { %p690_p6 = pneg %p689_p5  ;;  %p694_p10 = por %p693_p7, %p692_p4 }
  0x20   : > { %p696_p12 = por %p695_p13, %p694_p10 }
  0x22   : > { %p697_p1 = pnand %p696_p12, %p690_p6 }
  0x24   : > { %700 = shalt.err (!%p697_p1)
}
  0x25   : > { %s701_s20 = scalar_lea.vmem %s931_s4, 128  ;;  %s834_s26 = smov [#allocation5]  }
  0x26   : > { %p702_p2 = scmp.ne.s32.totalorder %s931_s4, %s701_s20  ;;  %s706_s27 = sshll.u32 %s834_s26, 4  ;;  %s707_s27 = int_to_ptr.vmem [resolvable:$false] %s706_s27 }
  0x27   : > { %s708_s28 = scalar_lea.vmem %s707_s27, 256  ;;  %p709_p9 = scmp.lt.s32.totalorder %s931_s4, %s707_s27 }
  0x28   : > { %p704_p5 = pnand %p702_p2, %p688_p3  ;;  %p710_p4 = scmp.lt.s32.totalorder %s708_s28, %s701_s20 }
  0x2a   : > { %p705_p11 = pneg %p704_p5  ;;  %p711_p7 = por %p710_p4, %p709_p9 }
  0x2c   : > { %p712_p10 = pnand %p711_p7, %p705_p11 }
  0x2e   : > { %715 = shalt.err (!%p712_p10)
}
  0x2f   : > { %s835_s29 = smov 32   ;;  %s836_s3 = smov 2  }
  0x30   : > { %613 = dma.hbm_to_vmem [thread:$0]  (!%p935_p0), %s929_s30, 128, %s931_s4, %s147_s6, %s835_s29, %s835_s29, %s836_s3  }
  0x31   : > { %p187_p12 = scmp.lt.s32.totalorder %s832_s14, 3  ;;  %s587_s7 = sshll.u32 %s922_s25, 1 }
  0x32   : > { %s588_s8 = sshll.u32 %s828_s13, 5  ;;  %p1156_p9 = scmp.ge.s32.totalorder %s832_s14, 1 }
  0x33   : > { %s980_s19 = scalar_lea.hbm %s1147_s1, %s588_s8  ;;  %s173_s20 = scalar_lea.vmem [#allocation8], %s587_s7 }
  0x34   : > { %p973_p11 = pnand %p1156_p9, %p187_p12  ;;  %s182_s26 = sshll.u32 %s173_s20, 4  ;;  %s183_s26 = int_to_ptr.vmem [resolvable:$true] %s182_s26 }
  0x35   : > { %s170_s30 = scalar_lea.sflag [#allocation9], %s922_s25  ;;  %s716_s4 = scalar_lea.hbm %s980_s19, 32 }
  0x36   : > { %s1157_s15 = scalar_select %p973_p11, 1, 0 }
  0x37   : > { %p717_p1 = scmp.ne.s32.totalorder %s980_s19, %s716_s4  ;;  %s721_s28 = scalar_lea.hbm %s1147_s1, 64 }
  0x38   : > { %p722_p2 = scmp.lt.u32.totalorder %s980_s19, %s1147_s1  ;;  %p723_p5 = scmp.lt.u32.totalorder %s721_s28, %s716_s4 }
  0x39   : > { %p719_p6 = pnand %p717_p1, %p688_p3  ;;  %p725_p7 = scmp.lt.u32.totalorder %s716_s4, %s980_s19 }
  0x3a   : > { %p724_p4 = por %p723_p5, %p722_p2 }
  0x3b   : > { %p720_p13 = pneg %p719_p6 }
  0x3c   : > { %p726_p10 = por %p725_p7, %p724_p4 }
  0x3e   : > { %p727_p12 = pnand %p726_p10, %p720_p13 }
  0x40   : > { %730 = shalt.err (!%p727_p12)
}
  0x41   : > { %s731_s25 = scalar_lea.vmem %s183_s26, 32  ;;  %s837_s7 = smov [#allocation8]  }
  0x42   : > { %p732_p9 = scmp.ne.s32.totalorder %s183_s26, %s731_s25  ;;  %s736_s8 = sshll.u32 %s837_s7, 4  ;;  %s737_s8 = int_to_ptr.vmem [resolvable:$false] %s736_s8 }
  0x43   : > { %s738_s16 = scalar_lea.vmem %s737_s8, 64  ;;  %p739_p8 = scmp.lt.s32.totalorder %s183_s26, %s737_s8 }
  0x44   : > { %p734_p1 = pnand %p732_p9, %p688_p3  ;;  %p740_p11 = scmp.lt.s32.totalorder %s738_s16, %s731_s25 }
  0x46   : > { %p735_p6 = pneg %p734_p1  ;;  %p741_p2 = por %p740_p11, %p739_p8 }
  0x48   : > { %p742_p5 = pnand %p741_p2, %p735_p6 }
  0x4a   : > { %745 = shalt.err (!%p742_p5)
}
  0x4b   : > { %616 = dma.hbm_to_vmem [thread:$0]  (!%p935_p0), %s980_s19, 32, %s183_s26, %s170_s30  }
  0x4c   : > { %p1158_p13 = scmp.ne.s32.totalorder %s1157_s15, 0 }
  0x4d   : > { %s1005_s18 = sand.u32 (!%p1158_p13), 1, %s816_s10   ;;  %p1159_p3 = scmp.ne.s32.totalorder (!%p1158_p13), %s1152_s21, 0 }
  0x4e   : > { %191 = sbr.rel (%p1158_p13) target bundleno = 181 (0xb5), region = 28  ;;  %s590_s20 = sshll.u32 (!%p1158_p13), %s1005_s18, 3 }
  0x4f   : > { %s194_s4 = scalar_lea.sflag (!%p1158_p13), [#allocation6], %s1005_s18  ;;  %s197_s6 = scalar_lea.vmem (!%p1158_p13), [#allocation5], %s590_s20 }
  0x55   : > { %799 = dma.done.wait (%p1159_p3), %s194_s4, 128  }
  0x56   : > { %801 = vsyncadd (%p1159_p3), %s194_s4, 4294967168  ;;  %s591_s5 = sshll.u32 %s1005_s18, 1  ;;  %s203_s15 = scalar_lea.sflag [#allocation9], %s1005_s18 }
  0x57   : > { %s206_s19 = scalar_lea.vmem [#allocation8], %s591_s5 }
  0x58   : > { %803 = dma.done.wait (%p1159_p3), %s203_s15, 32  }
  0x59   : > { %805 = vsyncadd (%p1159_p3), %s203_s15, 4294967264  ;;  %v247_v0 = vlaneseq  ;;  %v838_v1 = vmov 0.0   ;;  %vm259_vm0 = vcmask 1041408   ;;  %v241_v6 = vld [vmem:[%s197_s6] sm:$0x3]  ;;  %vm337_vm10 = vcmask 1041409  }
  0x5a   : > { %238 = vst [vmem:[#allocation2] sm:$0xf] %v838_v1  ;;  %239 = vst [vmem:[#allocation3] sm:$0xf] %v838_v1  ;;  %v242_v7 = vld [vmem:[%s197_s6 + $0x2] sm:$0x3] }
  0x5b   : > { %240 = vst [vmem:[#allocation4] sm:$0xf] %v838_v1  ;;  %v248_v2 = vshrl.u32 %v247_v0, 7  ;;  %v250_v3 = vand.u32 127, %v247_v0  ;;  %v243_v8 = vld [vmem:[%s197_s6 + $0x4] sm:$0x3] }
  0x5c   : > { %v244_v9 = vld [vmem:[%s197_s6 + $0x6] sm:$0x3]  ;;  %v245_v10 = vld [vmem:[%s206_s19] sm:$0x3]  ;;  %v260_v11 = vsel %vm259_vm0, %v241_v6, -inf  ;;  %v261_v12 = vsel %vm259_vm0, %v242_v7, -inf }
  0x5d   : > { %v254_v4 = vmul.u32 128, %v248_v2  ;;  %vm256_vm2 = vcmp.ne.s32.totalorder %v245_v10, 255  ;;  %v262_v13 = vsel %vm259_vm0, %v243_v8, -inf  ;;  %v263_v14 = vsel %vm259_vm0, %v244_v9, -inf  ;;  %s602_s21 = smul.u32 12, %s1005_s18  ;;  %s450_s25 = scalar_lea.sflag [#allocation7], %s1005_s18 }
  0x5e   : > { %v264_v15 = vmax.f32 %v260_v11, %v261_v12  ;;  %v265_v16 = vmax.f32 %v262_v13, %v263_v14  ;;  %vm291_vm3 = vcmp.gt.s32.totalorder %v245_v10, 0  ;;  %vm339_vm11 = vcmask 1042434   ;;  %s603_s30 = smul.u32 192, %s824_s12  ;;  %p1162_p0 = scmp.ne.s32.totalorder %s1153_s22, 0 }
  0x5f   : > { %v255_v5 = vadd.s32 %v254_v4, %v250_v3  ;;  %v292_v17 = vsel %vm291_vm3, %v245_v10, 0  ;;  %vm341_vm12 = vcmask 1043459   ;;  %s1055_s26 = scalar_lea.vmem [#allocation10], %s602_s21  ;;  %s839_s12 = smov [#allocation10]  }
  0x60   : > { %v266_v19 = vmax.f32 %v264_v15, %v265_v16  ;;  %vm293_vm5 = vcmp.lt.s32.totalorder %v292_v17, 3  ;;  %s465_s27 = sshll.u32 %s1055_s26, 4  ;;  %s1096_s3 = scalar_lea.hbm %s1148_s2, %s603_s30  ;;  %s1091_s27 = int_to_ptr.vmem [resolvable:$true] %s465_s27 }
  0x61   : > { %vm257_vm1 = vcmp.lt.s32.totalorder %v255_v5, 256  ;;  %v294_v20 = vsel %vm293_vm5, %v292_v17, 3  ;;  %s746_s7 = scalar_lea.vmem %s1091_s27, 192  ;;  %s750_s8 = sshll.u32 %s839_s12, 4  ;;  %s751_s8 = int_to_ptr.vmem [resolvable:$false] %s750_s8 }
  0x62   : > { %vm1023_vm4 = vmand %vm256_vm2, %vm257_vm1  ;;  %v267_v21 = vsub.f32 %v241_v6, %v266_v19  ;;  %v268_v22 = vsub.f32 %v242_v7, %v266_v19  ;;  %v269_v23 = vsub.f32 %v243_v8, %v266_v19  ;;  %v270_v24 = vsub.f32 %v244_v9, %v266_v19  ;;  %v391_v8 = vld [vmem:[#allocation4] sm:$0xf]  ;;  %p747_p8 = scmp.ne.s32.totalorder %s1091_s27, %s746_s7  ;;  %s752_s16 = scalar_lea.vmem %s751_s8, 384 }
  0x63   : > { %v1029_v25 = vsel %vm1023_vm4, %v294_v20, 4  ;;  %p753_p7 = scmp.lt.s32.totalorder %s1091_s27, %s751_s8  ;;  %p754_p10 = scmp.lt.s32.totalorder %s752_s16, %s746_s7 }
  0x64   : > { %v271_v26 = vmul.f32 1.442695, %v267_v21  ;;  %v273_v27 = vmul.f32 1.442695, %v268_v22  ;;  %v275_v28 = vmul.f32 1.442695, %v269_v23  ;;  %p748_p11 = pnand %p747_p8, %p1162_p0 }
  0x65   : > { %v277_v29 = vmul.f32 1.442695, %v270_v24  ;;  %vm296_vm6 = vcmp.eq.s32.totalorder %v1029_v25, 0  ;;  %vm297_vm7 = vcmp.eq.s32.totalorder %v1029_v25, 1  ;;  %vm298_vm8 = vcmp.eq.s32.totalorder %v1029_v25, 2  ;;  %p755_p12 = por %p754_p10, %p753_p7 }
  0x66   : > { %676 = vpow2.f32 %v271_v26  ;;  %vm299_vm9 = vcmp.eq.s32.totalorder %v1029_v25, 3  ;;  %v592_v30 = vsel %vm296_vm6, 1.0, %v838_v1  ;;  %v593_v31 = vsel %vm297_vm7, 1.0, %v838_v1  ;;  %p749_p4 = pneg %p748_p11 }
  0x67   : > { %678 = vpow2.f32 %v273_v27  ;;  %v594_v32 = vsel %vm298_vm8, 1.0, %v838_v1  ;;  %v595_v33 = vsel %vm299_vm9, 1.0, %v838_v1  ;;  %v400_v34 = vsel %vm259_vm0, %v592_v30, 0.0 }
  0x68   : > { %680 = vpow2.f32 %v275_v28  ;;  %v401_v35 = vrot.slane %v400_v34, 4  ;;  %v407_v36 = vsel %vm259_vm0, %v593_v31, 0.0  ;;  %v414_v37 = vsel %vm259_vm0, %v594_v32, 0.0  ;;  %p756_p9 = pnand %p755_p12, %p749_p4 }
  0x69   : > { %682 = vpow2.f32 %v277_v29  ;;  %v408_v38 = vrot.slane %v407_v36, 4  ;;  %v415_v39 = vrot.slane %v414_v37, 4  ;;  %v421_v40 = vsel %vm259_vm0, %v595_v33, 0.0 }
  0x6a   : > { %v402_v41 = vadd.f32 %v401_v35, %v400_v34  ;;  %v422_v42 = vrot.slane %v421_v40, 4 }
  0x6b   : > { %v409_v43 = vadd.f32 %v408_v38, %v407_v36  ;;  %v416_v44 = vadd.f32 %v415_v39, %v414_v37 }
  0x6c   : > { %v403_v45 = vrot.slane %v402_v41, 2  ;;  %v423_v46 = vadd.f32 %v422_v42, %v421_v40 }
  0x6d   : > { %v410_v47 = vrot.slane %v409_v43, 2  ;;  %v417_v48 = vrot.slane %v416_v44, 2 }
  0x6e   : > { %v404_v49 = vadd.f32 %v403_v45, %v402_v41  ;;  %v424_v50 = vrot.slane %v423_v46, 2 }
  0x6f   : > { %v411_v51 = vadd.f32 %v410_v47, %v409_v43  ;;  %v418_v52 = vadd.f32 %v417_v48, %v416_v44 }
  0x70   : > { %v677_v53 = vpop.eup %676  ;;  %v405_v54 = vrot.slane %v404_v49, 1  ;;  %v425_v55 = vadd.f32 %v424_v50, %v423_v46 }
  0x71   : > { %v679_v56 = vpop.eup %678  ;;  %v279_v57 = vsel %vm259_vm0, %v677_v53, 0.0  ;;  %v412_v58 = vrot.slane %v411_v51, 1  ;;  %v419_v59 = vrot.slane %v418_v52, 1 }
  0x72   : > { %v681_v60 = vpop.eup %680  ;;  %v280_v61 = vsel %vm259_vm0, %v679_v56, 0.0  ;;  %v406_v62 = vadd.f32 %v405_v54, %v404_v49  ;;  %v426_v63 = vrot.slane %v425_v55, 1 }
  0x73   : > { %v683_v0 = vpop.eup %682  ;;  %v281_v1 = vadd.f32 %v280_v61, %v279_v57  ;;  %v282_v2 = vsel %vm259_vm0, %v681_v60, 0.0  ;;  %v413_v3 = vadd.f32 %v412_v58, %v411_v51  ;;  %v420_v4 = vadd.f32 %v419_v59, %v418_v52 }
  0x74   : > { %v284_v5 = vsel %vm259_vm0, %v683_v0, 0.0  ;;  %v427_v6 = vadd.f32 %v426_v63, %v425_v55 }
  0x75   : > { %v283_v7 = vadd.f32 %v282_v2, %v281_v1  ;;  %v432_v9 = vsel %vm337_vm10, %v413_v3, %v406_v62 }
  0x76   : > { %v433_v10 = vsel %vm339_vm11, %v420_v4, %v432_v9 }
  0x77   : > { %v285_v11 = vadd.f32 %v284_v5, %v283_v7  ;;  %v434_v12 = vsel %vm341_vm12, %v427_v6, %v433_v10 }
  0x78   : > { %v436_v13 = vadd.f32 %v434_v12, %v391_v8  ;;  %v300_v12 = vld [vmem:[#allocation2] sm:$0xf] }
  0x79   : > { %684 = vrcp.f32 %v285_v11 }
  0x7a   : > { %437 = vst [vmem:[#allocation4] sm:$0xf] %v436_v13 }
  0x81   : > { %v446_v14 = vld [vmem:[#allocation4] sm:$0xf] }
  0x82   : > { %597 = vst [vmem:[%s1055_s26 + $0x8] sm:$0xf] %v446_v14 }
  0x83   : > { %v685_v15 = vpop.eup %684 }
  0x84   : > { %v287_v16 = vmul.f32 %v685_v15, %v677_v53  ;;  %v288_v17 = vmul.f32 %v685_v15, %v679_v56  ;;  %v289_v19 = vmul.f32 %v685_v15, %v681_v60  ;;  %v290_v20 = vmul.f32 %v685_v15, %v683_v0 }
  0x86   : > { %v301_v21 = vsel %vm296_vm6, %v287_v16, 0.0  ;;  %v302_v22 = vsel %vm297_vm7, %v288_v17, 0.0  ;;  %v303_v23 = vsel %vm298_vm8, %v289_v19, 0.0  ;;  %v304_v24 = vsel %vm299_vm9, %v290_v20, 0.0 }
  0x87   : > { %v305_v26 = vsel %vm259_vm0, %v301_v21, 0.0  ;;  %v312_v27 = vsel %vm259_vm0, %v302_v22, 0.0  ;;  %v319_v28 = vsel %vm259_vm0, %v303_v23, 0.0  ;;  %v326_v29 = vsel %vm259_vm0, %v304_v24, 0.0 }
  0x88   : > { %v306_v30 = vrot.slane %v305_v26, 4  ;;  %v313_v31 = vrot.slane %v312_v27, 4  ;;  %v320_v32 = vrot.slane %v319_v28, 4  ;;  %v327_v33 = vrot.slane %v326_v29, 4 }
  0x89   : > { %v349_v34 = vsel %vm1023_vm4, %v287_v16, 0.0  ;;  %v350_v35 = vsel %vm1023_vm4, %v288_v17, 0.0  ;;  %v351_v25 = vsel %vm1023_vm4, %v289_v19, 0.0  ;;  %v352_v36 = vsel %vm1023_vm4, %v290_v20, 0.0 }
  0x8a   : > { %v307_v37 = vadd.f32 %v306_v30, %v305_v26  ;;  %v314_v38 = vadd.f32 %v313_v31, %v312_v27  ;;  %v321_v39 = vadd.f32 %v320_v32, %v319_v28  ;;  %v328_v40 = vadd.f32 %v327_v33, %v326_v29  ;;  %v346_v27 = vld [vmem:[#allocation3] sm:$0xf] }
  0x8b   : > { %v353_v41 = vsel %vm259_vm0, %v349_v34, 0.0  ;;  %v360_v42 = vsel %vm259_vm0, %v350_v35, 0.0  ;;  %v367_v43 = vsel %vm259_vm0, %v351_v25, 0.0  ;;  %v374_v44 = vsel %vm259_vm0, %v352_v36, 0.0 }
  0x8c   : > { %v308_v45 = vrot.slane %v307_v37, 2  ;;  %v315_v46 = vrot.slane %v314_v38, 2  ;;  %v322_v47 = vrot.slane %v321_v39, 2  ;;  %v329_v48 = vrot.slane %v328_v40, 2 }
  0x8d   : > { %v354_v49 = vrot.slane %v353_v41, 4  ;;  %v361_v50 = vrot.slane %v360_v42, 4  ;;  %v368_v18 = vrot.slane %v367_v43, 4  ;;  %v375_v51 = vrot.slane %v374_v44, 4 }
  0x8e   : > { %v309_v52 = vadd.f32 %v308_v45, %v307_v37  ;;  %v316_v53 = vadd.f32 %v315_v46, %v314_v38  ;;  %v323_v54 = vadd.f32 %v322_v47, %v321_v39  ;;  %v330_v55 = vadd.f32 %v329_v48, %v328_v40 }
  0x8f   : > { %v355_v56 = vadd.f32 %v354_v49, %v353_v41  ;;  %v362_v57 = vadd.f32 %v361_v50, %v360_v42  ;;  %v369_v58 = vadd.f32 %v368_v18, %v367_v43  ;;  %v376_v59 = vadd.f32 %v375_v51, %v374_v44 }
  0x90   : > { %v310_v60 = vrot.slane %v309_v52, 1  ;;  %v317_v61 = vrot.slane %v316_v53, 1  ;;  %v324_v62 = vrot.slane %v323_v54, 1  ;;  %v331_v63 = vrot.slane %v330_v55, 1 }
  0x91   : > { %v356_v0 = vrot.slane %v355_v56, 2  ;;  %v363_v1 = vrot.slane %v362_v57, 2  ;;  %v370_v2 = vrot.slane %v369_v58, 2  ;;  %v377_v3 = vrot.slane %v376_v59, 2 }
  0x92   : > { %v311_v4 = vadd.f32 %v310_v60, %v309_v52  ;;  %v318_v5 = vadd.f32 %v317_v61, %v316_v53  ;;  %v325_v6 = vadd.f32 %v324_v62, %v323_v54  ;;  %v332_v7 = vadd.f32 %v331_v63, %v330_v55 }
  0x93   : > { %v357_v8 = vadd.f32 %v356_v0, %v355_v56  ;;  %v364_v9 = vadd.f32 %v363_v1, %v362_v57  ;;  %v371_v10 = vadd.f32 %v370_v2, %v369_v58  ;;  %v378_v11 = vadd.f32 %v377_v3, %v376_v59 }
  0x94   : > { %v338_v13 = vsel %vm337_vm10, %v318_v5, %v311_v4 }
  0x95   : > { %v340_v14 = vsel %vm339_vm11, %v325_v6, %v338_v13  ;;  %v358_v15 = vrot.slane %v357_v8, 1  ;;  %v365_v16 = vrot.slane %v364_v9, 1  ;;  %v372_v17 = vrot.slane %v371_v10, 1 }
  0x96   : > { %v342_v19 = vsel %vm341_vm12, %v332_v7, %v340_v14  ;;  %v379_v20 = vrot.slane %v378_v11, 1 }
  0x97   : > { %v344_v21 = vadd.f32 %v342_v19, %v300_v12  ;;  %v359_v22 = vadd.f32 %v358_v15, %v357_v8  ;;  %v366_v23 = vadd.f32 %v365_v16, %v364_v9  ;;  %v373_v24 = vadd.f32 %v372_v17, %v371_v10 }
  0x98   : > { %v380_v26 = vadd.f32 %v379_v20, %v378_v11 }
  0x99   : > { %345 = vst [vmem:[#allocation2] sm:$0xf] %v344_v21  ;;  %v385_v28 = vsel %vm337_vm10, %v366_v23, %v359_v22 }
  0x9a   : > { %v386_v29 = vsel %vm339_vm11, %v373_v24, %v385_v28 }
  0x9b   : > { %v387_v30 = vsel %vm341_vm12, %v380_v26, %v386_v29 }
  0x9c   : > { %v389_v31 = vadd.f32 %v387_v30, %v346_v27 }
  0x9e   : > { %390 = vst [vmem:[#allocation3] sm:$0xf] %v389_v31 }
  0xa0   : > { %v441_v32 = vld [vmem:[#allocation2] sm:$0xf] }
  0xa1   : > { %442 = vst [vmem:[%s1055_s26] sm:$0xf] %v441_v32 }
  0xa5   : > { %v443_v33 = vld [vmem:[#allocation3] sm:$0xf] }
  0xa6   : > { %596 = vst [vmem:[%s1055_s26 + $0x4] sm:$0xf] %v443_v33 }
  0xa7   : > { %759 = shalt.err (!%p756_p9)
}
  0xa8   : > { %s760_s20 = scalar_lea.hbm %s1096_s3, 192  ;;  %s764_s5 = scalar_lea.hbm %s1148_s2, 384 }
  0xa9   : > { %p761_p1 = scmp.ne.s32.totalorder %s1096_s3, %s760_s20  ;;  %p765_p5 = scmp.lt.u32.totalorder %s1096_s3, %s1148_s2 }
  0xaa   : > { %p766_p13 = scmp.lt.u32.totalorder %s764_s5, %s760_s20  ;;  %p768_p8 = scmp.lt.u32.totalorder %s760_s20, %s1096_s3 }
  0xab   : > { %p762_p6 = pnand %p761_p1, %p1162_p0 }
  0xac   : > { %p767_p3 = por %p766_p13, %p765_p5 }
  0xad   : > { %p763_p2 = pneg %p762_p6 }
  0xae   : > { %p769_p11 = por %p768_p8, %p767_p3 }
  0xb0   : > { %p770_p4 = pnand %p769_p11, %p763_p2 }
  0xb2   : > { %773 = shalt.err (!%p770_p4)
}
  0xb3   : > { %s840_s21 = smov 64   ;;  %s841_s26 = smov 4  }
  0xb4   : > { %608 = dma.vmem_to_hbm [thread:$0]  (%p1162_p0), %s1091_s27, 192, %s1096_s3, %s450_s25, %s840_s21, %s840_s21, %s841_s26  }
  0xb5 PF: > { %s480_s30 = sand.u32 1, %s812_s9   ;;  %p1163_p7 = scmp.ne.s32.totalorder %s1154_s24, 0 }
  0xb6   : > { %p1164_p10 = scmp.ge.s32.totalorder %s832_s14, 2  ;;  %s481_s28 = scalar_lea.sflag [#allocation7], %s480_s30 }
  0xb8   : > { %p618_p12 = pnand %p1164_p10, %p1163_p7 }
  0xba   : > { %807 = dma.done.wait (!%p618_p12), %s481_s28, 192  }
  0xbb   : > { %809 = vsyncadd (!%p618_p12), %s481_s28, 4294967104  ;;  %s21_s14 = sadd.s32 1, %s832_s14   ;;  %s1165_s9 = smov %s816_s10 }
  0xbc   : > { %p18_p9 = scmp.ge.s32.totalorder %s21_s14, 4   ;;  %s1166_s10 = smov %s820_s11 }
  0xbd   : > { %s1167_s11 = smov %s913_s23  ;;  %s1168_s12 = smov %s828_s13 }
  0xbe   : > { %s1169_s13 = smov %s1171_s17  ;;  %20 = sbr.rel (!%p18_p9) target bundleno = 8 (0x8), region = 96 }
  0xc5   :  { %486 = vsyncpa [#allocation6], 1 }
  0xc6   :  { %488 = vsyncpa [#allocation6 + $0x1], 1 }
  0xc7   :  { %489 = vsyncpa [#allocation9], 1 }
  0xc8   :  { %491 = vsyncpa [#allocation9 + $0x1], 1 }
  0xc9   :  { %492 = vsyncpa [#allocation7], 1 }
  0xca   :  { %494 = vsyncpa [#allocation7 + $0x1], 1 }

</bundles_post_ra>
